<compile_context>
chip_gen: v7x
topology: tpu7x:2x2x1
jax: 0.10.0
libtpu: 0.0.40
codegen_flags: <defaults>
</compile_context>

<pallas_src>
import jax
import jax.numpy as jnp
from jax.experimental import pallas as pl
from jax.experimental.pallas import tpu as pltpu


def _round_up(a, b):
    return ((a + b - 1) // b) * b


def _pool_kernel_inplace(idx_row_ref, idx_col_ref, inv_ref, x_ref, o_ref):
    """f32 path: accumulate group sums directly into the resident output tile."""
    k = pl.program_id(2)

    @pl.when(k == 0)
    def _():
        o_ref[...] = jnp.zeros_like(o_ref)

    # (TM, TK) membership mask: pure VPU broadcast-compare (row copy on the
    # sublane axis, column copy on the lane axis -> no in-kernel transpose).
    same = (idx_row_ref[...] == idx_col_ref[...]).astype(x_ref.dtype)
    o_ref[...] += jnp.dot(same, x_ref[...], preferred_element_type=jnp.float32)

    @pl.when(k == pl.num_programs(2) - 1)
    def _():
        # Precomputed exact 1/|group| per row: one broadcast multiply.
        o_ref[...] = o_ref[...] * inv_ref[...]


def _pool_kernel_scratch(idx_row_ref, idx_col_ref, inv_ref, x_ref, o_ref, acc_ref):
    """Low-precision-output path: f32 VMEM accumulator, cast on the last k step."""
    k = pl.program_id(2)

    @pl.when(k == 0)
    def _():
        acc_ref[...] = jnp.zeros_like(acc_ref)

    same = (idx_row_ref[...] == idx_col_ref[...]).astype(x_ref.dtype)
    acc_ref[...] += jnp.dot(same, x_ref[...], preferred_element_type=jnp.float32)

    @pl.when(k == pl.num_programs(2) - 1)
    def _():
        o_ref[...] = (acc_ref[...] * inv_ref[...]).astype(o_ref.dtype)


def _inverse_group_sizes(index):
    """Exact 1/|group(index[j])| per row, O(N log N), no torch.unique needed."""
    idx = index.astype(jnp.int32)
    n = idx.shape[0]
    sorted_idx = jnp.sort(idx)
    # First-occurrence rank in the sorted array == dense group id in [0, n).
    dense = jnp.searchsorted(sorted_idx, idx)
    counts = jnp.bincount(dense, length=n)
    return 1.0 / counts[dense].astype(jnp.float32)


def generic_pool(x, index, *, row_tile=1024, red_tile=256, feat_tile=2048):
    """Pallas implementation of GenericPool with the default mean-pool f.

    x:     (N, D) float array
    index: (N,)   integer group ids (arbitrary values, including negatives)
    """
    n, d = x.shape

    # Tile sizes: lane/sublane aligned, shrunk for small problems; TM is kept a
    # multiple of TK so the reduction grid stays simple.
    tk = min(red_tile, _round_up(n, 128))
    tm = min(_round_up(row_tile, tk), _round_up(n, tk))
    td = min(feat_tile, _round_up(d, 128))

    n_pad_rows = _round_up(n, tm)   # output / row axis padding
    n_pad_cols = _round_up(n, tk)   # reduction axis padding
    d_pad = _round_up(d, td)

    inv = _inverse_group_sizes(index)          # (n,) f32, exact, computed once
    idx = index.astype(jnp.int32)

    # Pad value for the index is irrelevant: counts were computed on the
    # unpadded index and padded x rows are zero, so padded rows/columns cannot
    # contaminate real groups. Padded rows get inv = 0 and are sliced away.
    idx_row = jnp.full((n_pad_rows,), -1, jnp.int32).at[:n].set(idx).reshape(n_pad_rows, 1)
    idx_col = jnp.full((n_pad_cols,), -1, jnp.int32).at[:n].set(idx).reshape(1, n_pad_cols)
    inv_col = jnp.zeros((n_pad_rows,), jnp.float32).at[:n].set(inv).reshape(n_pad_rows, 1)

    # Skip the padded copy of x when shapes already divide the tiles.
    if n_pad_cols != n or d_pad != d:
        x_in = jnp.zeros((n_pad_cols, d_pad), x.dtype).at[:n, :d].set(x)
    else:
        x_in = x

    out_is_f32 = x.dtype == jnp.float32
    kernel = _pool_kernel_inplace if out_is_f32 else _pool_kernel_scratch
    scratch = [] if out_is_f32 else [pltpu.VMEM((tm, td), jnp.float32)]

    grid = (n_pad_rows // tm, d_pad // td, n_pad_cols // tk)

    # VMEM budget: double-buffered out + x tiles, optional f32 accumulator,
    # tiny index/inv tiles; capped at 64 MiB so it is safe on v7x.
    xb = jnp.dtype(x.dtype).itemsize
    est = (2 * tm * td * xb                       # output tile (double-buffered)
           + 2 * tk * td * xb                     # x tile (double-buffered)
           + (0 if out_is_f32 else tm * td * 4)   # f32 accumulator scratch
           + 8 * (2 * tm + tk))                   # index / inv tiles
    vmem_limit = int(min(max(est + 16 * 1024 * 1024, 32 * 1024 * 1024),
                         64 * 1024 * 1024))

    out = pl.pallas_call(
        kernel,
        out_shape=jax.ShapeDtypeStruct((n_pad_rows, d_pad), x.dtype),
        grid=grid,
        in_specs=[
            pl.BlockSpec((tm, 1), lambda i, j, k: (i, 0)),    # row-oriented index
            pl.BlockSpec((1, tk), lambda i, j, k: (0, k)),    # lane-oriented index
            pl.BlockSpec((tm, 1), lambda i, j, k: (i, 0)),    # 1/|group| per row
            pl.BlockSpec((tk, td), lambda i, j, k: (k, j)),   # x slab for this k
        ],
        out_specs=pl.BlockSpec((tm, td), lambda i, j, k: (i, j)),
        scratch_shapes=scratch,
        compiler_params=pltpu.CompilerParams(
            dimension_semantics=("parallel", "parallel", "arbitrary"),
            vmem_limit_bytes=vmem_limit,
        ),
    )(idx_row, idx_col, inv_col, x_in)

    if n_pad_rows != n or d_pad != d:
        out = out[:n, :d]
    return out


def generic_pool_ref(x, index):
    """Pure-JAX reference matching the PyTorch module (default mean-pool f)."""
    same = (index[:, None] == index[None, :]).astype(jnp.float32)
    counts = jnp.sum(same, axis=1, keepdims=True)
    sums = jnp.matmul(same, x.astype(jnp.float32),
                      precision=jax.lax.Precision.HIGHEST)
    return (sums / counts).astype(x.dtype)


if __name__ == "__main__":
    key = jax.random.PRNGKey(0)
    k1, k2, k3, k4, k5, k6 = jax.random.split(key, 6)

    # Case 1: small shapes consistent with the module (grid collapses to one tile).
    N, D = 8, 32
    x = jax.random.normal(k1, (N, D), dtype=jnp.float32)
    index = jax.random.randint(k2, (N,), 0, 3, dtype=jnp.int32)
    out = jax.block_until_ready(generic_pool(x, index))
    ref = generic_pool_ref(x, index)
    assert out.shape == x.shape and out.dtype == x.dtype
    assert jnp.allclose(out, ref, atol=1e-4, rtol=1e-4)

    # Case 2: exercises the tiled path (multiple reduction blocks, row/D padding).
    N2, D2 = 384, 160
    x2 = jax.random.normal(k3, (N2, D2), dtype=jnp.float32)
    index2 = jax.random.randint(k4, (N2,), 0, 5, dtype=jnp.int32)
    out2 = jax.block_until_ready(generic_pool(x2, index2))
    ref2 = generic_pool_ref(x2, index2)
    assert out2.shape == x2.shape and out2.dtype == x2.dtype
    assert jnp.allclose(out2, ref2, atol=1e-4, rtol=1e-4)

    # Case 3: aligned shapes -> exercises the no-padding fast path.
    N3, D3 = 256, 128
    x3 = jax.random.normal(k5, (N3, D3), dtype=jnp.float32)
    index3 = jax.random.randint(k6, (N3,), 0, 7, dtype=jnp.int32)
    out3 = jax.block_until_ready(generic_pool(x3, index3))
    ref3 = generic_pool_ref(x3, index3)
    assert out3.shape == x3.shape and out3.dtype == x3.dtype
    assert jnp.allclose(out3, ref3, atol=1e-4, rtol=1e-4)

    # Case 4: bf16 input -> exercises the f32-scratch accumulator variant.
    x4 = x.astype(jnp.bfloat16)
    out4 = jax.block_until_ready(generic_pool(x4, index))
    ref4 = generic_pool_ref(x4, index)
    assert out4.shape == x4.shape and out4.dtype == x4.dtype
    assert jnp.allclose(out4.astype(jnp.float32), ref4.astype(jnp.float32),
                        atol=2e-2, rtol=2e-2)

    print("KERNEL_OK")
</pallas_src>

<mosaic_0001>
module attributes {stable_mosaic.version = 11 : i64} {
  func.func @_pool_kernel_inplace(%arg0: i32, %arg1: i32, %arg2: i32, %arg3: memref<128x1xi32, #tpu.memory_space<vmem>>, %arg4: memref<1x128xi32, #tpu.memory_space<vmem>>, %arg5: memref<128x1xf32, #tpu.memory_space<vmem>>, %arg6: memref<128x128xf32, #tpu.memory_space<vmem>>, %arg7: memref<128x128xf32, #tpu.memory_space<vmem>>) attributes {dimension_semantics = [#tpu.dimension_semantics<parallel>, #tpu.dimension_semantics<parallel>, #tpu.dimension_semantics<arbitrary>], iteration_bounds = array<i64: 1, 1, 1>, scalar_prefetch = 0 : i64, scratch_operands = 0 : i64, tpu.core_type = #tpu.core_type<tc>, window_params = [{transform_indices = @transform_0, window_bounds = array<i64: 128, 1>}, {transform_indices = @transform_1, window_bounds = array<i64: 1, 128>}, {transform_indices = @transform_2, window_bounds = array<i64: 128, 1>}, {transform_indices = @transform_3, window_bounds = array<i64: 128, 128>}, {transform_indices = @transform_4, window_bounds = array<i64: 128, 128>}]} {
    %c0_i32 = arith.constant 0 : i32
    %0 = arith.cmpi eq, %arg2, %c0_i32 : i32
    %1 = arith.extui %0 : i1 to i32
    %c0_i32_0 = arith.constant 0 : i32
    %2 = arith.cmpi ne, %1, %c0_i32_0 : i32
    scf.if %2 {
      %cst_12 = arith.constant 0.000000e+00 : f32
      %18 = vector.broadcast %cst_12 : f32 to vector<128x128xf32>
      %c0_13 = arith.constant 0 : index
      %c0_14 = arith.constant 0 : index
      %19 = vector.load %arg7[%c0_13, %c0_14] : memref<128x128xf32, #tpu.memory_space<vmem>>, vector<128x128xf32>
      tpu.vector_store %arg7[%c0_13, %c0_14], %18 {strides = array<i32>} : memref<128x128xf32, #tpu.memory_space<vmem>>, vector<128x128xf32>,
    } else {
    }
    %c0 = arith.constant 0 : index
    %c0_1 = arith.constant 0 : index
    %3 = vector.load %arg3[%c0, %c0_1] : memref<128x1xi32, #tpu.memory_space<vmem>>, vector<128x1xi32>
    %c0_2 = arith.constant 0 : index
    %c0_3 = arith.constant 0 : index
    %4 = vector.load %arg4[%c0_2, %c0_3] : memref<1x128xi32, #tpu.memory_space<vmem>>, vector<1x128xi32>
    %5 = vector.broadcast %3 : vector<128x1xi32> to vector<128x128xi32>
    %6 = vector.broadcast %4 : vector<1x128xi32> to vector<128x128xi32>
    %7 = arith.cmpi eq, %5, %6 : vector<128x128xi32>
    %8 = arith.extui %7 : vector<128x128xi1> to vector<128x128xi32>
    %9 = arith.sitofp %8 : vector<128x128xi32> to vector<128x128xf32>
    %c0_4 = arith.constant 0 : index
    %c0_5 = arith.constant 0 : index
    %10 = vector.load %arg7[%c0_4, %c0_5] : memref<128x128xf32, #tpu.memory_space<vmem>>, vector<128x128xf32>
    %c0_6 = arith.constant 0 : index
    %c0_7 = arith.constant 0 : index
    %11 = vector.load %arg6[%c0_6, %c0_7] : memref<128x128xf32, #tpu.memory_space<vmem>>, vector<128x128xf32>
    %cst = arith.constant dense<0.000000e+00> : vector<128x128xf32>
    %12 = tpu.matmul %9, %11, %cst {dimension_numbers = #tpu.dot_dimension_numbers<[1], [0], [0], [1], [0, 0, 1, 1], [], []>} : vector<128x128xf32>, vector<128x128xf32>, vector<128x128xf32> -> vector<128x128xf32>
    %13 = arith.addf %10, %12 : vector<128x128xf32>
    %c0_8 = arith.constant 0 : index
    %c0_9 = arith.constant 0 : index
    %14 = vector.load %arg7[%c0_8, %c0_9] : memref<128x128xf32, #tpu.memory_space<vmem>>, vector<128x128xf32>
    tpu.vector_store %arg7[%c0_8, %c0_9], %13 {strides = array<i32>} : memref<128x128xf32, #tpu.memory_space<vmem>>, vector<128x128xf32>,
    %c0_i32_10 = arith.constant 0 : i32
    %15 = arith.cmpi eq, %arg2, %c0_i32_10 : i32
    %16 = arith.extui %15 : i1 to i32
    %c0_i32_11 = arith.constant 0 : i32
    %17 = arith.cmpi ne, %16, %c0_i32_11 : i32
    scf.if %17 {
      %c0_12 = arith.constant 0 : index
      %c0_13 = arith.constant 0 : index
      %18 = vector.load %arg7[%c0_12, %c0_13] : memref<128x128xf32, #tpu.memory_space<vmem>>, vector<128x128xf32>
      %c0_14 = arith.constant 0 : index
      %c0_15 = arith.constant 0 : index
      %19 = vector.load %arg5[%c0_14, %c0_15] : memref<128x1xf32, #tpu.memory_space<vmem>>, vector<128x1xf32>
      %20 = vector.broadcast %19 : vector<128x1xf32> to vector<128x128xf32>
      %21 = arith.mulf %18, %20 : vector<128x128xf32>
      %c0_16 = arith.constant 0 : index
      %c0_17 = arith.constant 0 : index
      %22 = vector.load %arg7[%c0_16, %c0_17] : memref<128x128xf32, #tpu.memory_space<vmem>>, vector<128x128xf32>
      tpu.vector_store %arg7[%c0_16, %c0_17], %21 {strides = array<i32>} : memref<128x128xf32, #tpu.memory_space<vmem>>, vector<128x128xf32>,
    } else {
    }
    return
  }
  func.func @transform_0(%arg0: i32, %arg1: i32, %arg2: i32) -> (i32, i32) {
    %c0_i32 = arith.constant 0 : i32
    %c0_i32_0 = arith.constant 0 : i32
    return %arg0, %c0_i32 : i32, i32
  }
  func.func @transform_1(%arg0: i32, %arg1: i32, %arg2: i32) -> (i32, i32) {
    %c0_i32 = arith.constant 0 : i32
    %c0_i32_0 = arith.constant 0 : i32
    return %c0_i32, %arg2 : i32, i32
  }
  func.func @transform_2(%arg0: i32, %arg1: i32, %arg2: i32) -> (i32, i32) {
    %c0_i32 = arith.constant 0 : i32
    %c0_i32_0 = arith.constant 0 : i32
    return %arg0, %c0_i32 : i32, i32
  }
  func.func @transform_3(%arg0: i32, %arg1: i32, %arg2: i32) -> (i32, i32) {
    %c0_i32 = arith.constant 0 : i32
    return %arg2, %arg1 : i32, i32
  }
  func.func @transform_4(%arg0: i32, %arg1: i32, %arg2: i32) -> (i32, i32) {
    %c0_i32 = arith.constant 0 : i32
    return %arg0, %arg1 : i32, i32
  }
}

</mosaic_0001>

<bundles_post_ra>
// kernel: tpu_custom_call.1
= control target key start
LH: loop header
LB: loop body
LE: loop exit
PB: predicated region body
PF: predicated region fallthrough
CT: control target
= control target key end

     0   :  { %v728_v2 = vmov 0   ;;  %s917_s0 = inlined_call_operand.vmem [shape: s32[128,1], index: 0, kind: input, shape index: {}]   ;;  %s918_s1 = inlined_call_operand.vmem [shape: s32[1,128], index: 1, kind: input, shape index: {}]   ;;  %s919_s2 = inlined_call_operand.vmem [shape: f32[128,1], index: 2, kind: input, shape index: {}]   ;;  %s920_s3 = inlined_call_operand.vmem [shape: f32[128,128], index: 3, kind: input, shape index: {}]   ;;  %s921_s4 = inlined_call_operand.hbm [shape: f32[128,128], index: 4, kind: output, shape index: {}]  }
   0x1   :  { %v39_v0 = vld [vmem:[%s917_s0 + $0x8] sm:$0xff]  ;;  %v38_v1 = vld [vmem:[%s917_s0] sm:$0xff]  ;;  %703 = vset.pattern.permute.xlu1 %v728_v2  ;;  %702 = vset.pattern.permute.xlu0 %v728_v2  ;;  %v48_v5 = vld [vmem:[%s917_s0 + $0x50] sm:$0xff] }
   0x2   :  { %59 = vperm.xlu1 %703, %v39_v0   ;;  %56 = vperm.xlu0 %702, %v38_v1   ;;  %v47_v3 = vld [vmem:[%s917_s0 + $0x48] sm:$0xff]  ;;  %v46_v4 = vld [vmem:[%s917_s0 + $0x40] sm:$0xff]  ;;  %v40_v6 = vld [vmem:[%s917_s0 + $0x10] sm:$0xff] }
   0x3   :  { %v49_v7 = vld [vmem:[%s917_s0 + $0x58] sm:$0xff]  ;;  %v171_v9 = vld [vmem:[%s920_s3] sm:$0xff]  ;;  %v172_v10 = vld [vmem:[%s920_s3 + $0x8] sm:$0xff] }
   0x4   :  { %v41_v8 = vld [vmem:[%s917_s0 + $0x18] sm:$0xff]  ;;  %v173_v11 = vld [vmem:[%s920_s3 + $0x10] sm:$0xff]  ;;  %v648_v13 = vpack.c.bf16 %v172_v10, %v171_v9  ;;  %v175_v15 = vld [vmem:[%s920_s3 + $0x20] sm:$0xff] }
   0x5   :  { %v174_v12 = vld [vmem:[%s920_s3 + $0x18] sm:$0xff]  ;;  %v176_v16 = vld [vmem:[%s920_s3 + $0x28] sm:$0xff]  ;;  %v50_v17 = vld [vmem:[%s917_s0 + $0x60] sm:$0xff] }
   0x6   :  { %83 = vperm.xlu1 %703, %v47_v3   ;;  %80 = vperm.xlu0 %702, %v46_v4   ;;  %v652_v14 = vpack.c.bf16 %v174_v12, %v173_v11  ;;  %v42_v18 = vld [vmem:[%s917_s0 + $0x20] sm:$0xff] }
   0x7   :  { %649 = vmatprep.subr.bf16.mxu0 %v648_v13  ;;  %680 = vmatprep.subr.bf16.mxu1 %v648_v13 }
   0x8   :  { %651 = vmatpush3.bf16.msra.mxu0 %v648_v13  ;;  %688 = vmatpush3.bf16.msra.mxu1 %v648_v13 }
   0xa   :  { %86 = vperm.xlu1 %703, %v48_v5   ;;  %62 = vperm.xlu0 %702, %v40_v6  }
   0xe   :  { %89 = vperm.xlu1 %703, %v49_v7   ;;  %65 = vperm.xlu0 %702, %v41_v8  }
   0xf   :  { %9 = vsyncpa [#allocation3], 0  ;;  %653 = vmatprep.subr.bf16.mxu0 %v652_v14  ;;  %681 = vmatprep.subr.bf16.mxu1 %v652_v14  ;;  %v656_v19 = vpack.c.bf16 %v176_v16, %v175_v15  ;;  %v177_v20 = vld [vmem:[%s920_s3 + $0x30] sm:$0xff]  ;;  %v178_v21 = vld [vmem:[%s920_s3 + $0x38] sm:$0xff]  ;;  %v729_v60 = vmov 1.0  }
  0x10   :  { %v51_v22 = vld [vmem:[%s917_s0 + $0x68] sm:$0xff]  ;;  %655 = vmatpush3.bf16.msra.mxu0 %v652_v14  ;;  %689 = vmatpush3.bf16.msra.mxu1 %v652_v14  ;;  %v660_v24 = vpack.c.bf16 %v178_v21, %v177_v20  ;;  %v179_v25 = vld [vmem:[%s920_s3 + $0x40] sm:$0xff]  ;;  %v52_v27 = vld [vmem:[%s917_s0 + $0x70] sm:$0xff] }
  0x11   :  { %v43_v23 = vld [vmem:[%s917_s0 + $0x28] sm:$0xff]  ;;  %657 = vmatprep.subr.bf16.mxu0 %v656_v19  ;;  %682 = vmatprep.subr.bf16.mxu1 %v656_v19  ;;  %v44_v28 = vld [vmem:[%s917_s0 + $0x30] sm:$0xff]  ;;  %v182_v31 = vld [vmem:[%s920_s3 + $0x58] sm:$0xff] }
  0x12   :  { %92 = vperm.xlu1 %703, %v50_v17   ;;  %68 = vperm.xlu0 %702, %v42_v18   ;;  %v180_v26 = vld [vmem:[%s920_s3 + $0x48] sm:$0xff]  ;;  %v181_v30 = vld [vmem:[%s920_s3 + $0x50] sm:$0xff]  ;;  %v53_v32 = vld [vmem:[%s917_s0 + $0x78] sm:$0xff] }
  0x13   :  { %v664_v29 = vpack.c.bf16 %v180_v26, %v179_v25  ;;  %v45_v33 = vld [vmem:[%s917_s0 + $0x38] sm:$0xff]  ;;  %v668_v34 = vpack.c.bf16 %v182_v31, %v181_v30  ;;  %v183_v35 = vld [vmem:[%s920_s3 + $0x60] sm:$0xff]  ;;  %v184_v36 = vld [vmem:[%s920_s3 + $0x68] sm:$0xff] }
  0x14   :  { %659 = vmatpush3.bf16.msra.mxu0 %v656_v19  ;;  %690 = vmatpush3.bf16.msra.mxu1 %v656_v19  ;;  %v384_v37 = vld [vmem:[%s919_s2 + $0x8] sm:$0xff]  ;;  %v383_v38 = vld [vmem:[%s919_s2] sm:$0xff]  ;;  %v672_v39 = vpack.c.bf16 %v184_v36, %v183_v35  ;;  %v185_v40 = vld [vmem:[%s920_s3 + $0x70] sm:$0xff] }
  0x15   :  { %661 = vmatprep.subr.bf16.mxu0 %v660_v24  ;;  %683 = vmatprep.subr.bf16.mxu1 %v660_v24  ;;  %v186_v41 = vld [vmem:[%s920_s3 + $0x78] sm:$0xff]  ;;  %v385_v43 = vld [vmem:[%s919_s2 + $0x10] sm:$0xff]  ;;  %v388_v45 = vld [vmem:[%s919_s2 + $0x28] sm:$0xff] }
  0x16   :  { %95 = vperm.xlu1 %703, %v51_v22   ;;  %71 = vperm.xlu0 %702, %v43_v23   ;;  %v386_v42 = vld [vmem:[%s919_s2 + $0x18] sm:$0xff]  ;;  %v676_v44 = vpack.c.bf16 %v186_v41, %v185_v40  ;;  %v387_v46 = vld [vmem:[%s919_s2 + $0x20] sm:$0xff]  ;;  %v389_v48 = vld [vmem:[%s919_s2 + $0x30] sm:$0xff] }
  0x17   :  { %v390_v47 = vld [vmem:[%s919_s2 + $0x38] sm:$0xff]  ;;  %v392_v49 = vld [vmem:[%s919_s2 + $0x48] sm:$0xff]  ;;  %v391_v50 = vld [vmem:[%s919_s2 + $0x40] sm:$0xff] }
  0x18   :  { %663 = vmatpush3.bf16.msra.mxu0 %v660_v24  ;;  %691 = vmatpush3.bf16.msra.mxu1 %v660_v24  ;;  %v394_v51 = vld [vmem:[%s919_s2 + $0x58] sm:$0xff]  ;;  %v393_v52 = vld [vmem:[%s919_s2 + $0x50] sm:$0xff]  ;;  %v396_v53 = vld [vmem:[%s919_s2 + $0x68] sm:$0xff] }
  0x19   :  { %665 = vmatprep.subr.bf16.mxu0 %v664_v29  ;;  %684 = vmatprep.subr.bf16.mxu1 %v664_v29  ;;  %v395_v54 = vld [vmem:[%s919_s2 + $0x60] sm:$0xff]  ;;  %v398_v55 = vld [vmem:[%s919_s2 + $0x78] sm:$0xff]  ;;  %v397_v56 = vld [vmem:[%s919_s2 + $0x70] sm:$0xff] }
  0x1a   :  { %98 = vperm.xlu1 %703, %v52_v27   ;;  %74 = vperm.xlu0 %702, %v44_v28   ;;  %v527_v57 = vld [vmem:[%s918_s1] ss:$0 sm:$0xff]  ;;  %s730_s1 = smov [#allocation2]  }
  0x1b   :  { %s516_s2 = sshll.u32 %s730_s1, 4  ;;  %s517_s2 = int_to_ptr.vmem [resolvable:$true] %s516_s2 }
  0x1c   :  { %667 = vmatpush3.bf16.msra.mxu0 %v664_v29  ;;  %692 = vmatpush3.bf16.msra.mxu1 %v664_v29  ;;  %s704_s6 = scalar_lea.vmem %s517_s2, 2048  ;;  %p709_p1 = scmp.lt.s32.totalorder %s517_s2, %s517_s2 }
  0x1d   :  { %669 = vmatprep.subr.bf16.mxu0 %v668_v34  ;;  %685 = vmatprep.subr.bf16.mxu1 %v668_v34  ;;  %p705_p0 = scmp.ne.s32.totalorder %s517_s2, %s704_s6  ;;  %p710_p2 = scmp.lt.s32.totalorder %s704_s6, %s704_s6 }
  0x1e   :  { %101 = vperm.xlu1 %703, %v53_v32   ;;  %77 = vperm.xlu0 %702, %v45_v33  }
  0x1f   :  { %p711_p3 = por %p710_p2, %p709_p1 }
  0x20   :  { %671 = vmatpush3.bf16.msra.mxu0 %v668_v34  ;;  %693 = vmatpush3.bf16.msra.mxu1 %v668_v34 }
  0x21   :  { %673 = vmatprep.subr.bf16.mxu0 %v672_v39  ;;  %686 = vmatprep.subr.bf16.mxu1 %v672_v39  ;;  %p712_p4 = pnand %p711_p3, %p705_p0 }
  0x22   :  { %406 = vperm.xlu1 %703, %v384_v37   ;;  %401 = vperm.xlu0 %702, %v383_v38  }
  0x24   :  { %675 = vmatpush3.bf16.msra.mxu0 %v672_v39  ;;  %694 = vmatpush3.bf16.msra.mxu1 %v672_v39 }
  0x25   :  { %677 = vmatprep.subr.bf16.mxu0 %v676_v44  ;;  %687 = vmatprep.subr.bf16.mxu1 %v676_v44 }
  0x26   :  { %416 = vperm.xlu1 %703, %v386_v42   ;;  %411 = vperm.xlu0 %702, %v385_v43  }
  0x28   :  { %679 = vmatpush3.bf16.msra.mxu0 %v676_v44  ;;  %695 = vmatpush3.bf16.msra.mxu1 %v676_v44 }
  0x2a   :  { %426 = vperm.xlu1 %703, %v388_v45   ;;  %421 = vperm.xlu0 %702, %v387_v46  }
  0x2e   :  { %436 = vperm.xlu1 %703, %v390_v47   ;;  %431 = vperm.xlu0 %702, %v389_v48  }
  0x32   :  { %446 = vperm.xlu1 %703, %v392_v49   ;;  %441 = vperm.xlu0 %702, %v391_v50  }
  0x36   :  { %456 = vperm.xlu1 %703, %v394_v51   ;;  %451 = vperm.xlu0 %702, %v393_v52  }
  0x3a   :  { %466 = vperm.xlu1 %703, %v396_v53   ;;  %461 = vperm.xlu0 %702, %v395_v54  }
  0x3e   :  { %476 = vperm.xlu1 %703, %v398_v55   ;;  %471 = vperm.xlu0 %702, %v397_v56  }
  0x81   :  { %v60_v58 = vpop.permute.xlu1 %59  ;;  %v57_v59 = vpop.permute.xlu0 %56 }
  0x82   :  { %vm108_vm0 = vcmp.eq.s32.totalorder %v60_v58, %v527_v57  ;;  %vm107_vm1 = vcmp.eq.s32.totalorder %v57_v59, %v527_v57 }
  0x83   :  { %624 = vmatprep.mubr.msk.f32.mxu0 %vm107_vm1, %v729_v60 }
  0x84   :  { %625 = vmatmul.mubr.msk.f32.vlgmr.msra.gmra.mrb[0].mxu0 %vm108_vm0, %v729_v60 }
  0x85   :  { %v84_v61 = vpop.permute.xlu1 %83  ;;  %v81_v62 = vpop.permute.xlu0 %80 }
  0x86   :  { %vm116_vm2 = vcmp.eq.s32.totalorder %v84_v61, %v527_v57  ;;  %vm115_vm3 = vcmp.eq.s32.totalorder %v81_v62, %v527_v57 }
  0x87   :  { %636 = vmatprep.mubr.msk.f32.mxu1 %vm115_vm3, %v729_v60 }
  0x88   :  { %637 = vmatmul.mubr.msk.f32.vlgmr.msra.gmra.mrb[0].mxu1 %vm116_vm2, %v729_v60 }
  0x89   :  { %v87_v63 = vpop.permute.xlu1 %86  ;;  %v63_v0 = vpop.permute.xlu0 %62 }
  0x8a   :  { %vm117_vm4 = vcmp.eq.s32.totalorder %v87_v63, %v527_v57  ;;  %vm109_vm5 = vcmp.eq.s32.totalorder %v63_v0, %v527_v57 }
  0x8b   :  { %627 = vmatprep.mubr.msk.f32.mxu0 %vm109_vm5, %v729_v60  ;;  %639 = vmatprep.mubr.msk.f32.mxu1 %vm117_vm4, %v729_v60 }
  0x8d   :  { %v90_v1 = vpop.permute.xlu1 %89  ;;  %v66_v2 = vpop.permute.xlu0 %65 }
  0x8e   :  { %vm118_vm6 = vcmp.eq.s32.totalorder %v90_v1, %v527_v57  ;;  %vm110_vm7 = vcmp.eq.s32.totalorder %v66_v2, %v527_v57 }
  0x8f   :  { %628 = vmatmul.mubr.msk.f32.gmra.mrb[2].mxu0 %vm110_vm7, %v729_v60  ;;  %640 = vmatmul.mubr.msk.f32.gmra.mrb[2].mxu1 %vm118_vm6, %v729_v60 }
  0x91   :  { %v93_v3 = vpop.permute.xlu1 %92  ;;  %v69_v4 = vpop.permute.xlu0 %68 }
  0x92   :  { %vm119_vm8 = vcmp.eq.s32.totalorder %v93_v3, %v527_v57  ;;  %vm111_vm9 = vcmp.eq.s32.totalorder %v69_v4, %v527_v57 }
  0x93   :  { %630 = vmatprep.mubr.msk.f32.mxu0 %vm111_vm9, %v729_v60  ;;  %642 = vmatprep.mubr.msk.f32.mxu1 %vm119_vm8, %v729_v60 }
  0x95   :  { %v96_v5 = vpop.permute.xlu1 %95  ;;  %v72_v6 = vpop.permute.xlu0 %71 }
  0x96   :  { %vm120_vm10 = vcmp.eq.s32.totalorder %v96_v5, %v527_v57  ;;  %vm112_vm11 = vcmp.eq.s32.totalorder %v72_v6, %v527_v57 }
  0x97   :  { %631 = vmatmul.mubr.msk.f32.gmra.mrb[4].mxu0 %vm112_vm11, %v729_v60  ;;  %643 = vmatmul.mubr.msk.f32.gmra.mrb[4].mxu1 %vm120_vm10, %v729_v60 }
  0x99   :  { %v99_v7 = vpop.permute.xlu1 %98  ;;  %v75_v8 = vpop.permute.xlu0 %74 }
  0x9a   :  { %vm121_vm12 = vcmp.eq.s32.totalorder %v99_v7, %v527_v57  ;;  %vm113_vm13 = vcmp.eq.s32.totalorder %v75_v8, %v527_v57 }
  0x9b   :  { %633 = vmatprep.mubr.msk.f32.mxu0 %vm113_vm13, %v729_v60  ;;  %645 = vmatprep.mubr.msk.f32.mxu1 %vm121_vm12, %v729_v60 }
  0x9d   :  { %v102_v9 = vpop.permute.xlu1 %101  ;;  %v78_v10 = vpop.permute.xlu0 %77 }
  0x9e   :  { %vm122_vm14 = vcmp.eq.s32.totalorder %v102_v9, %v527_v57  ;;  %vm114_vm15 = vcmp.eq.s32.totalorder %v78_v10, %v527_v57 }
  0x9f   :  { %634 = vmatmul.mubr.msk.f32.gmra.mrb[6].mxu0 %vm114_vm15, %v729_v60  ;;  %646 = vmatmul.mubr.msk.f32.gmra.mrb[6].mxu1 %vm122_vm14, %v729_v60 }
  0xa1   :  { %v407_v11 = vpop.permute.xlu1 %406  ;;  %v402_v12 = vpop.permute.xlu0 %401 }
  0xa5   :  { %v417_v13 = vpop.permute.xlu1 %416  ;;  %v412_v14 = vpop.permute.xlu0 %411 }
  0xa9   :  { %v427_v15 = vpop.permute.xlu1 %426  ;;  %v422_v16 = vpop.permute.xlu0 %421 }
  0xad   :  { %v437_v17 = vpop.permute.xlu1 %436  ;;  %v432_v19 = vpop.permute.xlu0 %431 }
  0xb1   :  { %v447_v25 = vpop.permute.xlu1 %446  ;;  %v442_v26 = vpop.permute.xlu0 %441 }
  0xb5   :  { %v457_v33 = vpop.permute.xlu1 %456  ;;  %v452_v34 = vpop.permute.xlu0 %451 }
  0xb9   :  { %v467_v43 = vpop.permute.xlu1 %466  ;;  %v462_v44 = vpop.permute.xlu0 %461 }
  0xbd   :  { %v477_v53 = vpop.permute.xlu1 %476  ;;  %v472_v54 = vpop.permute.xlu0 %471 }
 0x157   :  { %v626_v18 = vpop.f32.mrb[0].mxu0 }
 0x158   :  { %v253_v20 = vpop.f32.mrb[1].mxu0  ;;  %v480_v21 = vmul.f32 %v626_v18, %v407_v11 }
 0x159   :  { %v479_v22 = vmul.f32 %v402_v12, %v253_v20 }
 0x15a   :  { %496 = vst [vmem:[#allocation2 + $0x8] sm:$0xff] %v480_v21 }
 0x15b   :  { %v638_v23 = vpop.f32.mrb[0].mxu1  ;;  %495 = vst [vmem:[#allocation2] sm:$0xff] %v479_v22 }
 0x15c   :  { %v293_v24 = vpop.f32.mrb[1].mxu1  ;;  %v488_v27 = vmul.f32 %v638_v23, %v447_v25 }
 0x15d   :  { %v487_v28 = vmul.f32 %v442_v26, %v293_v24 }
 0x15e   :  { %504 = vst [vmem:[#allocation2 + $0x48] sm:$0xff] %v488_v27 }
 0x15f   :  { %503 = vst [vmem:[#allocation2 + $0x40] sm:$0xff] %v487_v28 }
 0x162   :  { %v629_v29 = vpop.f32.mrb[2].mxu0  ;;  %v641_v30 = vpop.f32.mrb[2].mxu1 }
 0x163   :  { %v263_v31 = vpop.f32.mrb[3].mxu0  ;;  %v303_v32 = vpop.f32.mrb[3].mxu1  ;;  %v482_v35 = vmul.f32 %v629_v29, %v417_v13  ;;  %v490_v36 = vmul.f32 %v641_v30, %v457_v33 }
 0x164   :  { %v481_v37 = vmul.f32 %v412_v14, %v263_v31  ;;  %v489_v38 = vmul.f32 %v452_v34, %v303_v32 }
 0x165   :  { %498 = vst [vmem:[#allocation2 + $0x18] sm:$0xff] %v482_v35  ;;  %506 = vst [vmem:[#allocation2 + $0x58] sm:$0xff] %v490_v36 }
 0x166   :  { %497 = vst [vmem:[#allocation2 + $0x10] sm:$0xff] %v481_v37  ;;  %505 = vst [vmem:[#allocation2 + $0x50] sm:$0xff] %v489_v38 }
 0x16a   :  { %v632_v39 = vpop.f32.mrb[4].mxu0  ;;  %v644_v40 = vpop.f32.mrb[4].mxu1 }
 0x16b   :  { %v273_v41 = vpop.f32.mrb[5].mxu0  ;;  %v313_v42 = vpop.f32.mrb[5].mxu1  ;;  %v484_v45 = vmul.f32 %v632_v39, %v427_v15  ;;  %v492_v46 = vmul.f32 %v644_v40, %v467_v43 }
 0x16c   :  { %v483_v47 = vmul.f32 %v422_v16, %v273_v41  ;;  %v491_v48 = vmul.f32 %v462_v44, %v313_v42 }
 0x16d   :  { %500 = vst [vmem:[#allocation2 + $0x28] sm:$0xff] %v484_v45  ;;  %508 = vst [vmem:[#allocation2 + $0x68] sm:$0xff] %v492_v46 }
 0x16e   :  { %499 = vst [vmem:[#allocation2 + $0x20] sm:$0xff] %v483_v47  ;;  %507 = vst [vmem:[#allocation2 + $0x60] sm:$0xff] %v491_v48 }
 0x172   :  { %v635_v49 = vpop.f32.mrb[6].mxu0  ;;  %v647_v50 = vpop.f32.mrb[6].mxu1 }
 0x173   :  { %v283_v51 = vpop.f32.mrb[7].mxu0  ;;  %v323_v52 = vpop.f32.mrb[7].mxu1  ;;  %v486_v55 = vmul.f32 %v635_v49, %v437_v17  ;;  %v494_v56 = vmul.f32 %v647_v50, %v477_v53 }
 0x174   :  { %v485_v57 = vmul.f32 %v432_v19, %v283_v51  ;;  %v493_v58 = vmul.f32 %v472_v54, %v323_v52 }
 0x175   :  { %502 = vst [vmem:[#allocation2 + $0x38] sm:$0xff] %v486_v55  ;;  %510 = vst [vmem:[#allocation2 + $0x78] sm:$0xff] %v494_v56 }
 0x176   :  { %501 = vst [vmem:[#allocation2 + $0x30] sm:$0xff] %v485_v57  ;;  %509 = vst [vmem:[#allocation2 + $0x70] sm:$0xff] %v493_v58 }
 0x177   :  { %715 = shalt.err (!%p712_p4)
}
 0x178   :  { %s716_s9 = scalar_lea.hbm %s921_s4, 2048 }
 0x179   :  { %p717_p5 = scmp.ne.s32.totalorder %s921_s4, %s716_s9  ;;  %p720_p6 = scmp.lt.u32.totalorder %s716_s9, %s921_s4 }
 0x17b   :  { %p722_p7 = pnand %p720_p6, %p717_p5 }
 0x17d   :  { %725 = shalt.err (!%p722_p7)
}
 0x17e   :  { %s731_s13 = smov 128   ;;  %s732_s14 = smov 8  }
 0x17f   :  { %522 = dma.vmem_to_hbm [thread:$0]  %s517_s2, 2048, %s921_s4, [#allocation3], %s731_s13, %s731_s13, %s732_s14  }
 0x180   :  { %726 = dma.done.wait [#allocation3], 2048  }
 0x181   :  { %727 = vsyncadd [#allocation3], 4294965248 }
 0x182   :  { %526 = vsyncpa [#allocation3], 1 }

</bundles_post_ra>
